<compile_context>
chip_gen: v7x
topology: tpu7x:2x2x1
jax: 0.10.0
libtpu: 0.0.40
codegen_flags: <defaults>
</compile_context>

<pallas_src>
import functools

import jax
import jax.numpy as jnp
from jax import lax
from jax.experimental import pallas as pl
from jax.experimental.pallas import tpu as pltpu


# ---------------------------------------------------------------------------
# In-kernel helpers
# ---------------------------------------------------------------------------
def _project_heads(tok, w_ref, tb, n):
    """Project tokens with per-head weights and fold heads into the batch dim.

    tok:   (tb*n, dim) activation tile (compute dtype)
    w_ref: (heads, dim, dim_head) weight ref (compute dtype)
    returns (heads*tb, n, dim_head) float32; batch index = h*tb + window.
    Leading-dim ref indexing + leading-axis concat only -> no lane relayouts.
    """
    heads = w_ref.shape[0]
    parts = []
    for h in range(heads):                       # static unroll, heads is small
        p = jnp.dot(tok, w_ref[h], preferred_element_type=jnp.float32)
        parts.append(p.reshape(tb, n, p.shape[-1]))
    if heads == 1:
        return parts[0]
    return jnp.concatenate(parts, axis=0)


def _attention_core(q_b, k_b, v_b, *, scale, mxu_dtype, approx_recip):
    """Scaled dot-product attention as ONE batched einsum pair (batch=heads*TB)."""
    sim = jnp.einsum('bqd,bkd->bqk',
                     q_b.astype(mxu_dtype), k_b.astype(mxu_dtype),
                     preferred_element_type=jnp.float32) * scale
    m = jnp.max(sim, axis=-1, keepdims=True)
    p = jnp.exp(sim - m)
    denom = jnp.sum(p, axis=-1, keepdims=True)
    if approx_recip:
        attn = p * pl.reciprocal(denom, approx=True)   # EUP slot, ~2^-12 rel err
    else:
        attn = p / denom
    return jnp.einsum('bqk,bkd->bqd',
                      attn.astype(mxu_dtype), v_b.astype(mxu_dtype),
                      preferred_element_type=jnp.float32)


def _output_proj(out_b, wo_ref, bo_ref, o_ref, *, tb, n, mxu_dtype):
    """Lane-dense channel-major output: o = sum_h Wo_h @ out_h^T + b -> (dim, TB*N)."""
    heads, dim, dh = wo_ref.shape
    tbn = tb * n
    o_acc = jnp.zeros((dim, tbn), jnp.float32)
    for h in range(heads):                       # per-head weight blocks: no lane slices
        out_h = out_b[h * tb:(h + 1) * tb].reshape(tbn, dh).astype(mxu_dtype)
        o_acc = o_acc + lax.dot_general(
            wo_ref[h], out_h,
            dimension_numbers=(((1,), (1,)), ((), ())),
            preferred_element_type=jnp.float32)
    o_ref[...] = (o_acc + bo_ref[...]).astype(o_ref.dtype)


# ---------------------------------------------------------------------------
# Kernels (one grid step == TB spatial windows)
# ---------------------------------------------------------------------------
def _attn_kernel_noskip(x_ref, wq_ref, wk_ref, wv_ref, wo_ref, bo_ref, o_ref, *,
                        scale, tb, n_tok, mxu_dtype, approx_recip):
    dim = x_ref.shape[-1]
    xf = x_ref[...].reshape(tb * n_tok, dim)
    q_b = _project_heads(xf, wq_ref, tb, n_tok)
    k_b = _project_heads(xf, wk_ref, tb, n_tok)
    v_b = _project_heads(xf, wv_ref, tb, n_tok)
    out_b = _attention_core(q_b, k_b, v_b, scale=scale, mxu_dtype=mxu_dtype,
                            approx_recip=approx_recip)
    _output_proj(out_b, wo_ref, bo_ref, o_ref, tb=tb, n=n_tok, mxu_dtype=mxu_dtype)


def _attn_kernel_skip(x_ref, s_ref, wq_ref, wk_ref, wv_ref, wo_ref, bo_ref, o_ref, *,
                      scale, tb, n_tok, mxu_dtype, approx_recip):
    dim = x_ref.shape[-1]
    n_kv = 2 * n_tok
    xf = x_ref[...].reshape(tb * n_tok, dim)
    # K/V tokens per window = [x-window tokens, skip-window tokens]; concat in
    # VMEM along the token (sublane) axis -> x is DMA'd from HBM exactly once.
    kvf = jnp.concatenate([x_ref[...], s_ref[...]], axis=1).reshape(tb * n_kv, dim)
    q_b = _project_heads(xf, wq_ref, tb, n_tok)
    k_b = _project_heads(kvf, wk_ref, tb, n_kv)
    v_b = _project_heads(kvf, wv_ref, tb, n_kv)
    out_b = _attention_core(q_b, k_b, v_b, scale=scale, mxu_dtype=mxu_dtype,
                            approx_recip=approx_recip)
    _output_proj(out_b, wo_ref, bo_ref, o_ref, tb=tb, n=n_tok, mxu_dtype=mxu_dtype)


# ---------------------------------------------------------------------------
# Glue: NCHW <-> windowed (tokens, channels) layout (pure reshapes/transposes)
# ---------------------------------------------------------------------------
def _window_partition(t, w):
    # 'b c (x w1) (y w2) -> (b x y) (w1 w2) c'
    b, C, H, W = t.shape
    nx, ny = H // w, W // w
    t = t.reshape(b, C, nx, w, ny, w)
    t = jnp.transpose(t, (0, 2, 4, 3, 5, 1))             # b, x, y, w1, w2, C
    return t.reshape(b * nx * ny, w * w, C)


def _window_unpartition(t, b, C, H, W, w):
    # '(b x y) (w1 w2) c -> b c (x w1) (y w2)'
    nx, ny = H // w, W // w
    t = t.reshape(b, nx, ny, w, w, C)
    t = jnp.transpose(t, (0, 5, 1, 3, 2, 4))             # b, C, x, w1, y, w2
    return t.reshape(b, C, H, W)


def _vmem_capacity_bytes():
    """Generation-aware VMEM capacity; conservative (v7x = 64 MiB) fallback."""
    try:
        info = pltpu.get_tpu_info()
        for attr in ("vmem_capacity_bytes", "vmem_bytes", "vmem_size_bytes"):
            v = getattr(info, attr, None)
            if isinstance(v, int) and v > 0:
                return int(v)
    except Exception:
        pass
    return 64 * 1024 * 1024


def _pick_window_batch(n_windows, tokens_per_window, bytes_per_window, weight_bytes,
                       *, target_tokens, vmem_budget, min_grid):
    """Largest divisor TB of n_windows that fits the token/VMEM budget while
    keeping at least `min_grid` grid steps (so v7x's 2 TensorCores both work)."""
    token_cap = max(target_tokens, tokens_per_window)

    def fits(tb):
        return (tb * tokens_per_window <= token_cap
                and tb * bytes_per_window + weight_bytes <= vmem_budget)

    divisors = [d for d in range(1, n_windows + 1) if n_windows % d == 0]
    preferred = [d for d in divisors if fits(d) and n_windows // d >= min_grid]
    if preferred:
        return max(preferred)
    feasible = [d for d in divisors if fits(d)]
    return max(feasible) if feasible else 1


# ---------------------------------------------------------------------------
# Wrapper around pallas_call
# ---------------------------------------------------------------------------
def attention_pallas(x, params, *, heads, dim_head, window_size, skip=None,
                     compute_dtype=jnp.float32, target_tokens=2048,
                     approx_reciprocal=True):
    b, dim, H, W = x.shape
    w = window_size
    N = w * w
    inner = heads * dim_head
    dh = dim_head
    scale = dim_head ** (-0.5)
    Wq, Wk, Wv, Wo, bo = params
    has_skip = skip is not None

    xw = _window_partition(x, w).astype(compute_dtype)            # (Bw, N, dim)
    Bw = xw.shape[0]
    sw = _window_partition(skip, w).astype(compute_dtype) if has_skip else None
    Nkv = 2 * N if has_skip else N

    # Host-side weight prep: per-head (heads, dim, dim_head) tensors so the
    # kernel indexes the leading dim instead of lane-slicing fused projections.
    def _per_head_in(Wmat):            # (inner, dim) conv weight -> (heads, dim, dh)
        return jnp.transpose(Wmat.T.reshape(dim, heads, dh), (1, 0, 2)).astype(compute_dtype)

    Wq3, Wk3, Wv3 = _per_head_in(Wq), _per_head_in(Wk), _per_head_in(Wv)
    Wo3 = jnp.transpose(Wo.reshape(dim, heads, dh), (1, 0, 2)).astype(compute_dtype)
    bo2 = bo.reshape(dim, 1).astype(jnp.float32)

    # ---- VMEM-aware window-batch (TB) selection ----------------------------
    itemsize = jnp.dtype(compute_dtype).itemsize
    io_per_win = (N + (N if has_skip else 0)) * dim * itemsize + N * dim * itemsize
    work_per_win = 4 * ((N + 2 * Nkv) * inner          # q/k/v (f32)
                        + 2 * heads * N * Nkv          # scores + probs (f32)
                        + N * inner + N * dim)         # attn out + output acc (f32)
    bytes_per_win = 2 * io_per_win + work_per_win      # x2: double-buffered blocks
    weight_bytes = 4 * heads * dim * dh * itemsize + dim * 4
    vmem_cap = _vmem_capacity_bytes()
    TB = _pick_window_batch(
        Bw, N + (Nkv if has_skip else 0), bytes_per_win, weight_bytes,
        target_tokens=target_tokens, vmem_budget=vmem_cap // 2,
        min_grid=2 if Bw >= 2 else 1)
    Gw = Bw // TB
    vmem_limit = int(min(0.8 * vmem_cap,
                         max(32 * 1024 * 1024,
                             2 * (TB * bytes_per_win + weight_bytes))))

    cp = pltpu.CompilerParams(dimension_semantics=("parallel",),
                              vmem_limit_bytes=vmem_limit)

    x_spec = pl.BlockSpec((TB, N, dim), lambda i: (i, 0, 0))
    w_specs = [
        pl.BlockSpec((heads, dim, dh), lambda i: (0, 0, 0)),     # Wq (per-head)
        pl.BlockSpec((heads, dim, dh), lambda i: (0, 0, 0)),     # Wk (per-head)
        pl.BlockSpec((heads, dim, dh), lambda i: (0, 0, 0)),     # Wv (per-head)
        pl.BlockSpec((heads, dim, dh), lambda i: (0, 0, 0)),     # Wo (per-head)
        pl.BlockSpec((dim, 1), lambda i: (0, 0)),                # bias
    ]
    out_spec = pl.BlockSpec((None, dim, TB * N), lambda i: (i, 0, 0))
    out_shape = jax.ShapeDtypeStruct((Gw, dim, TB * N), compute_dtype)

    if not has_skip:
        kernel = functools.partial(_attn_kernel_noskip, scale=scale, tb=TB,
                                   n_tok=N, mxu_dtype=compute_dtype,
                                   approx_recip=approx_reciprocal)
        out_t = pl.pallas_call(
            kernel, out_shape=out_shape,
            grid_spec=pltpu.PrefetchScalarGridSpec(
                num_scalar_prefetch=0, grid=(Gw,),
                in_specs=[x_spec] + w_specs, out_specs=out_spec),
            compiler_params=cp,
        )(xw, Wq3, Wk3, Wv3, Wo3, bo2)
    else:
        kernel = functools.partial(_attn_kernel_skip, scale=scale, tb=TB,
                                   n_tok=N, mxu_dtype=compute_dtype,
                                   approx_recip=approx_reciprocal)
        s_spec = pl.BlockSpec((TB, N, dim), lambda i: (i, 0, 0))
        out_t = pl.pallas_call(
            kernel, out_shape=out_shape,
            grid_spec=pltpu.PrefetchScalarGridSpec(
                num_scalar_prefetch=0, grid=(Gw,),
                in_specs=[x_spec, s_spec] + w_specs, out_specs=out_spec),
            compiler_params=cp,
        )(xw, sw, Wq3, Wk3, Wv3, Wo3, bo2)

    # (Gw, dim, TB*N) channel-major -> (Bw, N, dim) token-major -> NCHW
    # (stays in compute dtype until after the unpartition -> fewer bytes moved)
    out = out_t.reshape(Gw, dim, TB, N)
    out = jnp.transpose(out, (0, 2, 3, 1)).reshape(Bw, N, dim)
    out = _window_unpartition(out, b, dim, H, W, w)
    return out.astype(x.dtype)


# ---------------------------------------------------------------------------
# Pure-JAX reference (mirrors the PyTorch forward) for a correctness check
# ---------------------------------------------------------------------------
def attention_ref(x, skip, Wq, Wk, Wv, Wo, bo, *, heads, dim_head, w):
    b, C, H, W = x.shape
    inner = heads * dim_head
    scale = dim_head ** (-0.5)

    def conv1x1(t, Wmat):
        return jnp.einsum('bchw,oc->bohw', t, Wmat, precision='highest')

    q = conv1x1(x, Wq)
    kv_in = x if skip is None else jnp.concatenate([x, skip], axis=0)
    k = conv1x1(kv_in, Wk)
    v = conv1x1(kv_in, Wv)

    nx, ny = H // w, W // w

    def rearr(t):  # 'B (h c) (x w1) (y w2) -> (B h x y) (w1 w2) c'
        B = t.shape[0]
        t = t.reshape(B, heads, dim_head, nx, w, ny, w)
        t = jnp.transpose(t, (0, 1, 3, 5, 4, 6, 2))
        return t.reshape(B * heads * nx * ny, w * w, dim_head)

    q_, k_, v_ = rearr(q), rearr(k), rearr(v)
    if skip is not None:
        Bp = q_.shape[0]
        k_ = jnp.concatenate([k_[:Bp], k_[Bp:]], axis=1)
        v_ = jnp.concatenate([v_[:Bp], v_[Bp:]], axis=1)

    sim = jnp.einsum('bid,bjd->bij', q_, k_, precision='highest') * scale
    attn = jax.nn.softmax(sim, axis=-1)
    out = jnp.einsum('bij,bjd->bid', attn, v_, precision='highest')

    out = out.reshape(b, heads, nx, ny, w, w, dim_head)
    out = jnp.transpose(out, (0, 1, 6, 2, 4, 3, 5))      # b, h, c, x, w1, y, w2
    out = out.reshape(b, inner, H, W)
    return conv1x1(out, Wo) + bo[None, :, None, None]


if __name__ == "__main__":
    # Small shapes consistent with the module
    dim, dim_head, heads, window_size = 32, 16, 2, 4
    b, H, W = 2, 8, 8
    inner = dim_head * heads

    key = jax.random.PRNGKey(0)
    kx, ks, k1, k2, k3, k4 = jax.random.split(key, 6)
    x = jax.random.normal(kx, (b, dim, H, W), dtype=jnp.float32)
    skip = jax.random.normal(ks, (b, dim, H, W), dtype=jnp.float32)

    # Deterministic parameter init (conv 1x1 weights as matrices)
    Wq = 0.1 * jax.random.normal(k1, (inner, dim), dtype=jnp.float32)
    Wkv = 0.1 * jax.random.normal(k2, (2 * inner, dim), dtype=jnp.float32)
    Wk, Wv = Wkv[:inner], Wkv[inner:]
    Wo = 0.1 * jax.random.normal(k3, (dim, inner), dtype=jnp.float32)
    bo = 0.1 * jax.random.normal(k4, (dim,), dtype=jnp.float32)
    params = (Wq, Wk, Wv, Wo, bo)

    ref1 = attention_ref(x, None, *params, heads=heads, dim_head=dim_head,
                         w=window_size)
    ref2 = attention_ref(x, skip, *params, heads=heads, dim_head=dim_head,
                         w=window_size)

    # Path 1: skip=None, f32 MXU operands
    out = attention_pallas(x, params, heads=heads, dim_head=dim_head,
                           window_size=window_size, skip=None,
                           compute_dtype=jnp.float32)
    out = jax.block_until_ready(out)
    assert out.shape == (b, dim, H, W)
    assert float(jnp.max(jnp.abs(out - ref1))) < 1e-2

    # Path 2: with skip (k/v get 2x tokens per window), f32 MXU operands
    out2 = attention_pallas(x, params, heads=heads, dim_head=dim_head,
                            window_size=window_size, skip=skip,
                            compute_dtype=jnp.float32)
    out2 = jax.block_until_ready(out2)
    assert out2.shape == (b, dim, H, W)
    assert float(jnp.max(jnp.abs(out2 - ref2))) < 1e-2

    # Path 3: bf16 MXU operands end-to-end (projections, scores, PV, out conv)
    # + bf16 writeback; softmax and all accumulations stay f32.
    out3 = attention_pallas(x, params, heads=heads, dim_head=dim_head,
                            window_size=window_size, skip=None,
                            compute_dtype=jnp.bfloat16)
    out3 = jax.block_until_ready(out3)
    assert float(jnp.max(jnp.abs(out3 - ref1))) < 8e-2

    # Path 4: bf16 + skip
    out4 = attention_pallas(x, params, heads=heads, dim_head=dim_head,
                            window_size=window_size, skip=skip,
                            compute_dtype=jnp.bfloat16)
    out4 = jax.block_until_ready(out4)
    assert float(jnp.max(jnp.abs(out4 - ref2))) < 8e-2

    print("KERNEL_OK")
</pallas_src>

<mosaic_0001>
module attributes {stable_mosaic.version = 11 : i64} {
  func.func @_attn_kernel_noskip(%arg0: i32, %arg1: memref<4x16x32xf32, #tpu.memory_space<vmem>>, %arg2: memref<2x32x16xf32, #tpu.memory_space<vmem>>, %arg3: memref<2x32x16xf32, #tpu.memory_space<vmem>>, %arg4: memref<2x32x16xf32, #tpu.memory_space<vmem>>, %arg5: memref<2x32x16xf32, #tpu.memory_space<vmem>>, %arg6: memref<32x1xf32, #tpu.memory_space<vmem>>, %arg7: memref<1x32x64xf32, #tpu.memory_space<vmem>>) attributes {dimension_semantics = [#tpu.dimension_semantics<parallel>], iteration_bounds = array<i64: 2>, scalar_prefetch = 0 : i64, scratch_operands = 0 : i64, tpu.core_type = #tpu.core_type<tc>, window_params = [{transform_indices = @transform_0, window_bounds = array<i64: 4, 16, 32>}, {pipeline_mode = #tpu.pipeline_mode<synchronous>, transform_indices = @transform_1, window_bounds = array<i64: 2, 32, 16>}, {pipeline_mode = #tpu.pipeline_mode<synchronous>, transform_indices = @transform_2, window_bounds = array<i64: 2, 32, 16>}, {pipeline_mode = #tpu.pipeline_mode<synchronous>, transform_indices = @transform_3, window_bounds = array<i64: 2, 32, 16>}, {pipeline_mode = #tpu.pipeline_mode<synchronous>, transform_indices = @transform_4, window_bounds = array<i64: 2, 32, 16>}, {pipeline_mode = #tpu.pipeline_mode<synchronous>, transform_indices = @transform_5, window_bounds = array<i64: 32, 1>}, {transform_indices = @transform_6, window_bounds = array<i64: 1, 32, 64>}]} {
    %c0 = arith.constant 0 : index
    %c0_0 = arith.constant 0 : index
    %c0_1 = arith.constant 0 : index
    %0 = vector.load %arg1[%c0, %c0_0, %c0_1] : memref<4x16x32xf32, #tpu.memory_space<vmem>>, vector<4x16x32xf32>
    %1 = vector.shape_cast %0 : vector<4x16x32xf32> to vector<64x32xf32>
    %c0_2 = arith.constant 0 : index
    %c0_3 = arith.constant 0 : index
    %c0_4 = arith.constant 0 : index
    %2 = vector.load %arg2[%c0_2, %c0_3, %c0_4] : memref<2x32x16xf32, #tpu.memory_space<vmem>>, vector<1x32x16xf32>
    %3 = vector.shape_cast %2 : vector<1x32x16xf32> to vector<32x16xf32>
    %cst = arith.constant dense<0.000000e+00> : vector<64x16xf32>
    %4 = tpu.matmul %1, %3, %cst {dimension_numbers = #tpu.dot_dimension_numbers<[1], [0], [0], [1], [0, 0, 1, 1], [], []>} : vector<64x32xf32>, vector<32x16xf32>, vector<64x16xf32> -> vector<64x16xf32>
    %5 = vector.shape_cast %4 : vector<64x16xf32> to vector<4x16x16xf32>
    %c1 = arith.constant 1 : index
    %c0_5 = arith.constant 0 : index
    %c0_6 = arith.constant 0 : index
    %6 = vector.load %arg2[%c1, %c0_5, %c0_6] : memref<2x32x16xf32, #tpu.memory_space<vmem>>, vector<1x32x16xf32>
    %7 = vector.shape_cast %6 : vector<1x32x16xf32> to vector<32x16xf32>
    %cst_7 = arith.constant dense<0.000000e+00> : vector<64x16xf32>
    %8 = tpu.matmul %1, %7, %cst_7 {dimension_numbers = #tpu.dot_dimension_numbers<[1], [0], [0], [1], [0, 0, 1, 1], [], []>} : vector<64x32xf32>, vector<32x16xf32>, vector<64x16xf32> -> vector<64x16xf32>
    %9 = vector.shape_cast %8 : vector<64x16xf32> to vector<4x16x16xf32>
    %10 = tpu.concatenate %5, %9 in 0 : vector<4x16x16xf32>, vector<4x16x16xf32> -> vector<8x16x16xf32>
    %c0_8 = arith.constant 0 : index
    %c0_9 = arith.constant 0 : index
    %c0_10 = arith.constant 0 : index
    %11 = vector.load %arg3[%c0_8, %c0_9, %c0_10] : memref<2x32x16xf32, #tpu.memory_space<vmem>>, vector<1x32x16xf32>
    %12 = vector.shape_cast %11 : vector<1x32x16xf32> to vector<32x16xf32>
    %cst_11 = arith.constant dense<0.000000e+00> : vector<64x16xf32>
    %13 = tpu.matmul %1, %12, %cst_11 {dimension_numbers = #tpu.dot_dimension_numbers<[1], [0], [0], [1], [0, 0, 1, 1], [], []>} : vector<64x32xf32>, vector<32x16xf32>, vector<64x16xf32> -> vector<64x16xf32>
    %14 = vector.shape_cast %13 : vector<64x16xf32> to vector<4x16x16xf32>
    %c1_12 = arith.constant 1 : index
    %c0_13 = arith.constant 0 : index
    %c0_14 = arith.constant 0 : index
    %15 = vector.load %arg3[%c1_12, %c0_13, %c0_14] : memref<2x32x16xf32, #tpu.memory_space<vmem>>, vector<1x32x16xf32>
    %16 = vector.shape_cast %15 : vector<1x32x16xf32> to vector<32x16xf32>
    %cst_15 = arith.constant dense<0.000000e+00> : vector<64x16xf32>
    %17 = tpu.matmul %1, %16, %cst_15 {dimension_numbers = #tpu.dot_dimension_numbers<[1], [0], [0], [1], [0, 0, 1, 1], [], []>} : vector<64x32xf32>, vector<32x16xf32>, vector<64x16xf32> -> vector<64x16xf32>
    %18 = vector.shape_cast %17 : vector<64x16xf32> to vector<4x16x16xf32>
    %19 = tpu.concatenate %14, %18 in 0 : vector<4x16x16xf32>, vector<4x16x16xf32> -> vector<8x16x16xf32>
    %c0_16 = arith.constant 0 : index
    %c0_17 = arith.constant 0 : index
    %c0_18 = arith.constant 0 : index
    %20 = vector.load %arg4[%c0_16, %c0_17, %c0_18] : memref<2x32x16xf32, #tpu.memory_space<vmem>>, vector<1x32x16xf32>
    %21 = vector.shape_cast %20 : vector<1x32x16xf32> to vector<32x16xf32>
    %cst_19 = arith.constant dense<0.000000e+00> : vector<64x16xf32>
    %22 = tpu.matmul %1, %21, %cst_19 {dimension_numbers = #tpu.dot_dimension_numbers<[1], [0], [0], [1], [0, 0, 1, 1], [], []>} : vector<64x32xf32>, vector<32x16xf32>, vector<64x16xf32> -> vector<64x16xf32>
    %23 = vector.shape_cast %22 : vector<64x16xf32> to vector<4x16x16xf32>
    %c1_20 = arith.constant 1 : index
    %c0_21 = arith.constant 0 : index
    %c0_22 = arith.constant 0 : index
    %24 = vector.load %arg4[%c1_20, %c0_21, %c0_22] : memref<2x32x16xf32, #tpu.memory_space<vmem>>, vector<1x32x16xf32>
    %25 = vector.shape_cast %24 : vector<1x32x16xf32> to vector<32x16xf32>
    %cst_23 = arith.constant dense<0.000000e+00> : vector<64x16xf32>
    %26 = tpu.matmul %1, %25, %cst_23 {dimension_numbers = #tpu.dot_dimension_numbers<[1], [0], [0], [1], [0, 0, 1, 1], [], []>} : vector<64x32xf32>, vector<32x16xf32>, vector<64x16xf32> -> vector<64x16xf32>
    %27 = vector.shape_cast %26 : vector<64x16xf32> to vector<4x16x16xf32>
    %28 = tpu.concatenate %23, %27 in 0 : vector<4x16x16xf32>, vector<4x16x16xf32> -> vector<8x16x16xf32>
    "tpu.trace_start"() <{level = 10 : i32, message = "bqd,bkd->bqk"}> : () -> ()
    %cst_24 = arith.constant dense<0.000000e+00> : vector<8x16x16xf32>
    %29 = tpu.matmul %10, %19, %cst_24 {dimension_numbers = #tpu.dot_dimension_numbers<[2], [2], [1], [1], [0, 0, 0, 1, 1, 1], [0], [0]>} : vector<8x16x16xf32>, vector<8x16x16xf32>, vector<8x16x16xf32> -> vector<8x16x16xf32>
    "tpu.trace_stop"() : () -> ()
    %cst_25 = arith.constant 2.500000e-01 : f32
    %30 = vector.broadcast %cst_25 : f32 to vector<8x16x16xf32>
    %31 = arith.mulf %29, %30 : vector<8x16x16xf32>
    %cst_26 = arith.constant dense<0xFF800000> : vector<8x16xf32>
    %32 = vector.multi_reduction <maximumf>, %31, %cst_26 [2] : vector<8x16x16xf32> to vector<8x16xf32>
    %33 = vector.shape_cast %32 : vector<8x16xf32> to vector<8x16x1xf32>
    %34 = vector.broadcast %33 : vector<8x16x1xf32> to vector<8x16x16xf32>
    %35 = arith.subf %31, %34 : vector<8x16x16xf32>
    %36 = math.exp %35 : vector<8x16x16xf32>
    %cst_27 = arith.constant dense<0.000000e+00> : vector<8x16xf32>
    %37 = vector.multi_reduction <add>, %36, %cst_27 [2] : vector<8x16x16xf32> to vector<8x16xf32>
    %38 = vector.shape_cast %37 : vector<8x16xf32> to vector<8x16x1xf32>
    %39 = tpu.reciprocal %38 {approx = true} : vector<8x16x1xf32> -> vector<8x16x1xf32>
    %40 = vector.broadcast %39 : vector<8x16x1xf32> to vector<8x16x16xf32>
    %41 = arith.mulf %36, %40 : vector<8x16x16xf32>
    "tpu.trace_start"() <{level = 10 : i32, message = "bqk,bkd->bqd"}> : () -> ()
    %cst_28 = arith.constant dense<0.000000e+00> : vector<8x16x16xf32>
    %42 = tpu.matmul %41, %28, %cst_28 {dimension_numbers = #tpu.dot_dimension_numbers<[2], [1], [1], [2], [0, 0, 0, 1, 1, 2], [0], [0]>} : vector<8x16x16xf32>, vector<8x16x16xf32>, vector<8x16x16xf32> -> vector<8x16x16xf32>
    %cst_29 = arith.constant 0.000000e+00 : f32
    "tpu.trace_stop"() : () -> ()
    %43 = vector.broadcast %cst_29 : f32 to vector<32x64xf32>
    %44 = vector.extract_strided_slice %42 {offsets = [0, 0, 0], sizes = [4, 16, 16], strides = [1, 1, 1]} : vector<8x16x16xf32> to vector<4x16x16xf32>
    %45 = vector.shape_cast %44 : vector<4x16x16xf32> to vector<64x16xf32>
    %c0_30 = arith.constant 0 : index
    %c0_31 = arith.constant 0 : index
    %c0_32 = arith.constant 0 : index
    %46 = vector.load %arg5[%c0_30, %c0_31, %c0_32] : memref<2x32x16xf32, #tpu.memory_space<vmem>>, vector<1x32x16xf32>
    %47 = vector.shape_cast %46 : vector<1x32x16xf32> to vector<32x16xf32>
    %cst_33 = arith.constant dense<0.000000e+00> : vector<32x64xf32>
    %48 = tpu.matmul %47, %45, %cst_33 {dimension_numbers = #tpu.dot_dimension_numbers<[1], [1], [0], [0], [0, 0, 1, 0], [], []>} : vector<32x16xf32>, vector<64x16xf32>, vector<32x64xf32> -> vector<32x64xf32>
    %49 = arith.addf %43, %48 : vector<32x64xf32>
    %50 = vector.extract_strided_slice %42 {offsets = [4, 0, 0], sizes = [4, 16, 16], strides = [1, 1, 1]} : vector<8x16x16xf32> to vector<4x16x16xf32>
    %51 = vector.shape_cast %50 : vector<4x16x16xf32> to vector<64x16xf32>
    %c1_34 = arith.constant 1 : index
    %c0_35 = arith.constant 0 : index
    %c0_36 = arith.constant 0 : index
    %52 = vector.load %arg5[%c1_34, %c0_35, %c0_36] : memref<2x32x16xf32, #tpu.memory_space<vmem>>, vector<1x32x16xf32>
    %53 = vector.shape_cast %52 : vector<1x32x16xf32> to vector<32x16xf32>
    %cst_37 = arith.constant dense<0.000000e+00> : vector<32x64xf32>
    %54 = tpu.matmul %53, %51, %cst_37 {dimension_numbers = #tpu.dot_dimension_numbers<[1], [1], [0], [0], [0, 0, 1, 0], [], []>} : vector<32x16xf32>, vector<64x16xf32>, vector<32x64xf32> -> vector<32x64xf32>
    %55 = arith.addf %49, %54 : vector<32x64xf32>
    %c0_38 = arith.constant 0 : index
    %c0_39 = arith.constant 0 : index
    %56 = vector.load %arg6[%c0_38, %c0_39] : memref<32x1xf32, #tpu.memory_space<vmem>>, vector<32x1xf32>
    %57 = vector.broadcast %56 : vector<32x1xf32> to vector<32x64xf32>
    %58 = arith.addf %55, %57 : vector<32x64xf32>
    %c0_40 = arith.constant 0 : index
    %c0_41 = arith.constant 0 : index
    %c0_42 = arith.constant 0 : index
    %59 = vector.load %arg7[%c0_40, %c0_41, %c0_42] : memref<1x32x64xf32, #tpu.memory_space<vmem>>, vector<1x32x64xf32>
    %60 = vector.shape_cast %59 : vector<1x32x64xf32> to vector<32x64xf32>
    %61 = vector.shape_cast %58 : vector<32x64xf32> to vector<1x32x64xf32>
    tpu.vector_store %arg7[%c0_40, %c0_41, %c0_42], %61 {strides = array<i32>} : memref<1x32x64xf32, #tpu.memory_space<vmem>>, vector<1x32x64xf32>,
    return
  }
  func.func @transform_0(%arg0: i32) -> (i32, i32, i32) {
    %c0_i32 = arith.constant 0 : i32
    %c0_i32_0 = arith.constant 0 : i32
    %c0_i32_1 = arith.constant 0 : i32
    return %arg0, %c0_i32, %c0_i32_0 : i32, i32, i32
  }
  func.func @transform_1(%arg0: i32) -> (i32, i32, i32) {
    %c0_i32 = arith.constant 0 : i32
    %c0_i32_0 = arith.constant 0 : i32
    %c0_i32_1 = arith.constant 0 : i32
    %c0_i32_2 = arith.constant 0 : i32
    return %c0_i32, %c0_i32_0, %c0_i32_1 : i32, i32, i32
  }
  func.func @transform_2(%arg0: i32) -> (i32, i32, i32) {
    %c0_i32 = arith.constant 0 : i32
    %c0_i32_0 = arith.constant 0 : i32
    %c0_i32_1 = arith.constant 0 : i32
    %c0_i32_2 = arith.constant 0 : i32
    return %c0_i32, %c0_i32_0, %c0_i32_1 : i32, i32, i32
  }
  func.func @transform_3(%arg0: i32) -> (i32, i32, i32) {
    %c0_i32 = arith.constant 0 : i32
    %c0_i32_0 = arith.constant 0 : i32
    %c0_i32_1 = arith.constant 0 : i32
    %c0_i32_2 = arith.constant 0 : i32
    return %c0_i32, %c0_i32_0, %c0_i32_1 : i32, i32, i32
  }
  func.func @transform_4(%arg0: i32) -> (i32, i32, i32) {
    %c0_i32 = arith.constant 0 : i32
    %c0_i32_0 = arith.constant 0 : i32
    %c0_i32_1 = arith.constant 0 : i32
    %c0_i32_2 = arith.constant 0 : i32
    return %c0_i32, %c0_i32_0, %c0_i32_1 : i32, i32, i32
  }
  func.func @transform_5(%arg0: i32) -> (i32, i32) {
    %c0_i32 = arith.constant 0 : i32
    %c0_i32_0 = arith.constant 0 : i32
    %c0_i32_1 = arith.constant 0 : i32
    return %c0_i32, %c0_i32_0 : i32, i32
  }
  func.func @transform_6(%arg0: i32) -> (i32, i32, i32) {
    %c0_i32 = arith.constant 0 : i32
    %c0_i32_0 = arith.constant 0 : i32
    %c0_i32_1 = arith.constant 0 : i32
    return %arg0, %c0_i32, %c0_i32_0 : i32, i32, i32
  }
}

</mosaic_0001>

<bundles_post_ra>
// kernel: tpu_custom_call.1
= control target key start
LH: loop header
LB: loop body
LE: loop exit
PB: predicated region body
PF: predicated region fallthrough
CT: control target
= control target key end

     0   :  { %11 = vsyncpa [#allocation3], 0  ;;  %s4439_s0 = inlined_call_operand.vmem [shape: f32[8,16,32], index: 0, kind: input, shape index: {}]   ;;  %s4440_s1 = inlined_call_operand.vmem [shape: f32[2,32,16], index: 1, kind: input, shape index: {}]   ;;  %s4441_s2 = inlined_call_operand.vmem [shape: f32[2,32,16], index: 2, kind: input, shape index: {}]   ;;  %s4442_s3 = inlined_call_operand.vmem [shape: f32[2,32,16], index: 3, kind: input, shape index: {}]   ;;  %s4443_s4 = inlined_call_operand.vmem [shape: f32[2,32,16], index: 4, kind: input, shape index: {}]   ;;  %s4444_s5 = inlined_call_operand.vmem [shape: f32[32,1], index: 5, kind: input, shape index: {}]   ;;  %s4445_s6 = inlined_call_operand.hbm [shape: f32[2,32,64], index: 6, kind: output, shape index: {}]  }
   0x1   :  { %13 = vsyncpa [#allocation3 + $0x1], 0  ;;  %s3820_s21 = smov 0   ;;  %s3822_s22 = smov 0  }
   0x2   :  { %s3824_s23 = smov 0   ;;  %s3826_s24 = smov 0  }
   0x3 LB: > { %s3841_s25 = sadd.s32 4294967295, %s3779_s24   ;;  %s2842_s26 = sadd.s32 4294967294, %s3779_s24   ;;  %s3779_s24 = sphi %s3826_s24, %s4453_s24   ;;  %s3775_s23 = sphi %s3824_s23, %s4452_s23   ;;  %s3771_s22 = sphi %s3822_s22, %s4451_s22   ;;  %s3767_s21 = sphi %s3820_s21, %s4450_s21  }
   0x4   : > { %s3845_s27 = sadd.s32 1, %s3779_s24   ;;  %s157_s28 = sadd.s32 1, %s3775_s23 }
   0x5   : > { %s154_s29 = ssub.s32 %s3779_s24, %s3845_s27  ;;  %p167_p0 = scmp.ne.s32.totalorder %s3775_s23, %s3771_s22 }
   0x6   : > { %p155_p1 = scmp.eq.s32.totalorder %s154_s29, 0  ;;  %p168_p2 = scmp.eq.s32.totalorder %s3841_s25, 1 }
   0x7   : > { %p173_p3 = scmp.ne.s32.totalorder %s3771_s22, %s3767_s21  ;;  %p174_p4 = scmp.eq.s32.totalorder %s2842_s26, 1 }
   0x8   : > { %s3856_s30 = scalar_select %p155_p1, %s3775_s23, %s157_s28  }
   0x9   : > { %p3858_p5 = por %p168_p2, %p167_p0  ;;  %p3862_p6 = por %p174_p4, %p173_p3 }
   0xa   : > { %p2845_p7 = scmp.ge.s32.totalorder %s3779_s24, 1  ;;  %p217_p8 = scmp.lt.s32.totalorder %s3779_s24, 3 }
   0xc   : > { %p218_p9 = pnand %p2845_p7, %p217_p8 }
   0xd   : > { %v263_v0 = vld [vmem:[%s4440_s1] sm:$0xff] (!%p218_p9)  ;;  %v264_v1 = vld [vmem:[%s4440_s1 + $0x8] sm:$0xff] (!%p218_p9)  ;;  %v265_v2 = vld [vmem:[%s4440_s1 + $0x10] sm:$0xff] (!%p218_p9)  ;;  %s2847_s15 = sshll.u32 (!%p218_p9), %s3841_s25, 2  ;;  %vm267_vm0 = vcmask (!%p218_p9), 261120   ;;  %vm945_vm1 = vcmask (!%p218_p9), 130048  }
   0xe   : > { %221 = sbr.rel (%p218_p9) target bundleno = 1297 (0x511), region = 44  ;;  %v3429_v3 = vpack.c.bf16 (!%p218_p9), %v264_v1, %v263_v0  ;;  %v266_v4 = vld [vmem:[%s4440_s1 + $0x18] sm:$0xff] (!%p218_p9)  ;;  %p249_p10 = scmp.lt.s32.totalorder (!%p218_p9), %s2847_s15, 7  ;;  %v2858_v5 = vld [vmem:[%s4440_s1 + $0x20] sm:$0xff] (!%p218_p9)  ;;  %v2859_v6 = vld [vmem:[%s4440_s1 + $0x28] sm:$0xff] (!%p218_p9)  ;;  %vm2761_vm3 = vcmask (!%p218_p9), 523264  }
   0xf   : > { %v3433_v7 = vpack.c.bf16 (!%p218_p9), %v266_v4, %v265_v2  ;;  %v3437_v8 = vpack.c.bf16 (!%p218_p9), %v2859_v6, %v2858_v5  ;;  %v507_v9 = vld [vmem:[%s4441_s2] sm:$0xff] (!%p218_p9)  ;;  %v508_v10 = vld [vmem:[%s4441_s2 + $0x8] sm:$0xff] (!%p218_p9)  ;;  %v2860_v11 = vld [vmem:[%s4440_s1 + $0x30] sm:$0xff] (!%p218_p9)  ;;  %s3782_s26 = smov (!%p218_p9), [#allocation2]  }
  0x10   : > { %3430 = vmatprep.subr.bf16.mxu0 (!%p218_p9), %v3429_v3  ;;  %v2861_v12 = vld [vmem:[%s4440_s1 + $0x38] sm:$0xff] (!%p218_p9)  ;;  %v2878_v14 = vld [vmem:[%s4441_s2 + $0x20] sm:$0xff] (!%p218_p9)  ;;  %v2879_v15 = vld [vmem:[%s4441_s2 + $0x28] sm:$0xff] (!%p218_p9)  ;;  %v3445_v16 = vpack.c.bf16 (!%p218_p9), %v508_v10, %v507_v9  ;;  %s3721_s28 = sshll.u32 (!%p218_p9), %s3782_s26, 4  ;;  %s3722_s28 = int_to_ptr.vmem [resolvable:$false] %s3721_s28 }
  0x11   : > { %3432 = vmatpush3.bf16.msra.mxu0 (!%p218_p9), %v3429_v3  ;;  %3438 = vmatprep.subr.bf16.mxu1 (!%p218_p9), %v3437_v8  ;;  %v3441_v13 = vpack.c.bf16 (!%p218_p9), %v2861_v12, %v2860_v11  ;;  %v509_v17 = vld [vmem:[%s4441_s2 + $0x10] sm:$0xff] (!%p218_p9)  ;;  %v510_v18 = vld [vmem:[%s4441_s2 + $0x18] sm:$0xff] (!%p218_p9)  ;;  %v3453_v19 = vpack.c.bf16 (!%p218_p9), %v2879_v15, %v2878_v14  ;;  %v726_v26 = vld [vmem:[%s4442_s3] sm:$0xff] (!%p218_p9)  ;;  %s3723_s9 = scalar_lea.vmem (!%p218_p9), %s3722_s28, 1024 }
  0x12   : > { %3434 = vmatprep.subr.bf16.mxu0 (!%p218_p9), %v3433_v7  ;;  %3440 = vmatpush3.bf16.msra.mxu1 (!%p218_p9), %v3437_v8  ;;  %v2880_v22 = vld [vmem:[%s4441_s2 + $0x30] sm:$0xff] (!%p218_p9)  ;;  %v2881_v23 = vld [vmem:[%s4441_s2 + $0x38] sm:$0xff] (!%p218_p9)  ;;  %v3449_v25 = vpack.c.bf16 (!%p218_p9), %v510_v18, %v509_v17  ;;  %v727_v27 = vld [vmem:[%s4442_s3 + $0x8] sm:$0xff] (!%p218_p9) }
  0x13   : > { %3442 = vmatprep.subr.bf16.mxu1 (!%p218_p9), %v3441_v13  ;;  %v3457_v28 = vpack.c.bf16 (!%p218_p9), %v2881_v23, %v2880_v22  ;;  %v2898_v30 = vld [vmem:[%s4442_s3 + $0x20] sm:$0xff] (!%p218_p9)  ;;  %v2899_v31 = vld [vmem:[%s4442_s3 + $0x28] sm:$0xff] (!%p218_p9)  ;;  %v3461_v33 = vpack.c.bf16 (!%p218_p9), %v727_v27, %v726_v26  ;;  %v728_v38 = vld [vmem:[%s4442_s3 + $0x10] sm:$0xff] (!%p218_p9) }
  0x14   : > { %v3469_v34 = vpack.c.bf16 (!%p218_p9), %v2899_v31, %v2898_v30  ;;  %v729_v39 = vld [vmem:[%s4442_s3 + $0x18] sm:$0xff] (!%p218_p9)  ;;  %v2900_v40 = vld [vmem:[%s4442_s3 + $0x30] sm:$0xff] (!%p218_p9)  ;;  %vm4052_vm2 = vmpackc.low (!%p218_p9), %vm945_vm1, %vm945_vm1 }
  0x15   : > { %s4455_s15 = smov (!%p249_p10, %s2847_s15), 7  ;;  %3436 = vmatpush3.bf16.msra.mxu0 %v3433_v7  ;;  %v2901_v41 = vld [vmem:[%s4442_s3 + $0x38] sm:$0xff]  ;;  %v3465_v42 = vpack.c.bf16 %v729_v39, %v728_v38 }
  0x16   : > { %s2991_s20 = sshll.u32 %s4455_s15, 4  ;;  %3446 = vmatprep.subr.bf16.mxu0 %v3445_v16  ;;  %3444 = vmatpush3.bf16.msra.mxu1 %v3441_v13  ;;  %v3473_v43 = vpack.c.bf16 %v2901_v41, %v2900_v40  ;;  %s245_s15 = sand.u32 1, %s3771_s22  }
  0x17   : > { %s3908_s29 = scalar_lea.vmem %s4439_s0, %s2991_s20  ;;  %3454 = vmatprep.subr.bf16.mxu1 %v3453_v19  ;;  %s2846_s13 = sshll.u32 %s245_s15, 5 }
  0x18   : > { %v3917_v20 = vld [vmem:[%s3908_s29] sm:$0xff]  ;;  %v3922_v21 = vld [vmem:[%s3908_s29 + $0x8] sm:$0xff]  ;;  %v3931_v24 = vld [vmem:[%s3908_s29 + $0x10] sm:$0xff]  ;;  %s247_s14 = scalar_lea.vmem [#allocation2], %s2846_s13 }
  0x19   : > { %3161 = vmatprep.mubr.msk.f32.mxu0 %vm267_vm0, %v3917_v20  ;;  %3181 = vmatprep.mubr.msk.f32.mxu1 %vm267_vm0, %v3917_v20  ;;  %v3946_v29 = vld [vmem:[%s3908_s29 + $0x18] sm:$0xff]  ;;  %v259_v32 = vld [vmem:[%s3908_s29 + $0x20] sm:$0xff]  ;;  %v260_v35 = vld [vmem:[%s3908_s29 + $0x28] sm:$0xff]  ;;  %s2780_s16 = sshll.u32 %s247_s14, 4  ;;  %s4394_s16 = int_to_ptr.vmem [resolvable:$true] %s2780_s16 }
  0x1a   : > { %3162 = vmatmul.mubr.msk.f32.vlgmr.msra.gmra.mrb[0].mxu0 %vm267_vm0, %v3922_v21  ;;  %3182 = vmatmul.mubr.msk.f32.vlgmr.msra.gmra.mrb[0].mxu1 %vm267_vm0, %v3922_v21  ;;  %v261_v36 = vld [vmem:[%s3908_s29 + $0x30] sm:$0xff]  ;;  %v262_v37 = vld [vmem:[%s3908_s29 + $0x38] sm:$0xff]  ;;  %s2992_s29 = sshll.u32 %s3841_s25, 9  ;;  %s4398_s25 = scalar_lea.sflag [#allocation3], %s245_s15 }
  0x1b   : > { %3164 = vmatprep.mubr.msk.f32.mxu0 %vm267_vm0, %v3931_v24  ;;  %3448 = vmatpush3.bf16.msra.mxu0 %v3445_v16  ;;  %s4392_s19 = scalar_lea.hbm %s4445_s6, %s2992_s29  ;;  %s3717_s20 = scalar_lea.vmem %s4394_s16, 512 }
  0x1c   : > { %3450 = vmatprep.subr.bf16.mxu0 %v3449_v25  ;;  %3184 = vmatprep.mubr.msk.f32.mxu1 %vm267_vm0, %v3931_v24  ;;  %p3718_p11 = scmp.ne.s32.totalorder %s4394_s16, %s3717_s20  ;;  %p3724_p0 = scmp.lt.s32.totalorder %s4394_s16, %s3722_s28 }
  0x1d   : > { %3456 = vmatpush3.bf16.msra.mxu1 %v3453_v19  ;;  %p3725_p1 = scmp.lt.s32.totalorder %s3723_s9, %s3717_s20 }
  0x1e   : > { %3165 = vmatmul.mubr.msk.f32.gmra.mrb[2].mxu0 %vm267_vm0, %v3946_v29  ;;  %3458 = vmatprep.subr.bf16.mxu1 %v3457_v28  ;;  %p3719_p12 = pnand %p3718_p11, %p3858_p5 }
  0x1f   : > { %3167 = vmatprep.mubr.msk.f32.mxu0 %vm267_vm0, %v259_v32  ;;  %3452 = vmatpush3.bf16.msra.mxu0 %v3449_v25  ;;  %p3726_p2 = por %p3725_p1, %p3724_p0 }
  0x20   : > { %3185 = vmatmul.mubr.msk.f32.gmra.mrb[2].mxu1 %vm267_vm0, %v3946_v29  ;;  %3462 = vmatprep.subr.bf16.mxu0 %v3461_v33  ;;  %p3720_p13 = pneg %p3719_p12 }
  0x21   : > { %3187 = vmatprep.mubr.msk.f32.mxu1 %vm267_vm0, %v259_v32  ;;  %3460 = vmatpush3.bf16.msra.mxu1 %v3457_v28 }
  0x22   : > { %3168 = vmatmul.mubr.msk.f32.gmra.mrb[4].mxu0 %vm267_vm0, %v260_v35  ;;  %3470 = vmatprep.subr.bf16.mxu1 %v3469_v34  ;;  %p3727_p3 = pnand %p3726_p2, %p3720_p13 }
  0x23   : > { %3170 = vmatprep.mubr.msk.f32.mxu0 %vm267_vm0, %v261_v36 }
  0x24   : > { %3188 = vmatmul.mubr.msk.f32.gmra.mrb[4].mxu1 %vm267_vm0, %v260_v35 }
  0x25   : > { %3190 = vmatprep.mubr.msk.f32.mxu1 %vm267_vm0, %v261_v36 }
  0x26   : > { %3171 = vmatmul.mubr.msk.f32.gmra.mrb[6].mxu0 %vm267_vm0, %v262_v37 }
  0x27   : > { %3201 = vmatprep.mubr.msk.f32.mxu0 %vm267_vm0, %v3917_v20 }
  0x28   : > { %3191 = vmatmul.mubr.msk.f32.gmra.mrb[6].mxu1 %vm267_vm0, %v262_v37 }
  0x29   : > { %3221 = vmatprep.mubr.msk.f32.mxu1 %vm267_vm0, %v3917_v20 }
  0x2a   : > { %3202 = vmatmul.mubr.msk.f32.vlgmr.msra.gmra.mrb[8].mxu0 %vm267_vm0, %v3922_v21 }
  0x2b   : > { %3204 = vmatprep.mubr.msk.f32.mxu0 %vm267_vm0, %v3931_v24  ;;  %3464 = vmatpush3.bf16.msra.mxu0 %v3461_v33 }
  0x2c   : > { %3222 = vmatmul.mubr.msk.f32.vlgmr.msra.gmra.mrb[8].mxu1 %vm267_vm0, %v3922_v21  ;;  %3466 = vmatprep.subr.bf16.mxu0 %v3465_v42 }
  0x2d   : > { %3224 = vmatprep.mubr.msk.f32.mxu1 %vm267_vm0, %v3931_v24  ;;  %3472 = vmatpush3.bf16.msra.mxu1 %v3469_v34 }
  0x2e   : > { %3205 = vmatmul.mubr.msk.f32.gmra.mrb[10].mxu0 %vm267_vm0, %v3946_v29  ;;  %3474 = vmatprep.subr.bf16.mxu1 %v3473_v43 }
  0x2f   : > { %3207 = vmatprep.mubr.msk.f32.mxu0 %vm267_vm0, %v259_v32  ;;  %3468 = vmatpush3.bf16.msra.mxu0 %v3465_v42 }
  0x30   : > { %3225 = vmatmul.mubr.msk.f32.gmra.mrb[10].mxu1 %vm267_vm0, %v3946_v29 }
  0x31   : > { %3227 = vmatprep.mubr.msk.f32.mxu1 %vm267_vm0, %v259_v32  ;;  %3476 = vmatpush3.bf16.msra.mxu1 %v3473_v43 }
  0x32   : > { %3208 = vmatmul.mubr.msk.f32.gmra.mrb[12].mxu0 %vm267_vm0, %v260_v35 }
  0x33   : > { %3210 = vmatprep.mubr.msk.f32.mxu0 %vm267_vm0, %v261_v36 }
  0x34   : > { %3228 = vmatmul.mubr.msk.f32.gmra.mrb[12].mxu1 %vm267_vm0, %v260_v35 }
  0x35   : > { %3230 = vmatprep.mubr.msk.f32.mxu1 %vm267_vm0, %v261_v36 }
  0x36   : > { %3211 = vmatmul.mubr.msk.f32.gmra.mrb[14].mxu0 %vm267_vm0, %v262_v37 }
  0x37   : > { %3241 = vmatprep.mubr.msk.f32.mxu0 %vm267_vm0, %v3917_v20 }
  0x38   : > { %3231 = vmatmul.mubr.msk.f32.gmra.mrb[14].mxu1 %vm267_vm0, %v262_v37 }
  0x39   : > { %3261 = vmatprep.mubr.msk.f32.mxu1 %vm267_vm0, %v3917_v20 }
  0x3a   : > { %3242 = vmatmul.mubr.msk.f32.vlgmr.msra.gmra.mrb[16].mxu0 %vm267_vm0, %v3922_v21 }
  0x3b   : > { %3244 = vmatprep.mubr.msk.f32.mxu0 %vm267_vm0, %v3931_v24 }
  0x3c   : > { %3262 = vmatmul.mubr.msk.f32.vlgmr.msra.gmra.mrb[16].mxu1 %vm267_vm0, %v3922_v21 }
  0x3d   : > { %3264 = vmatprep.mubr.msk.f32.mxu1 %vm267_vm0, %v3931_v24 }
  0x3e   : > { %3245 = vmatmul.mubr.msk.f32.gmra.mrb[18].mxu0 %vm267_vm0, %v3946_v29 }
  0x3f   : > { %3247 = vmatprep.mubr.msk.f32.mxu0 %vm267_vm0, %v259_v32 }
  0x40   : > { %3265 = vmatmul.mubr.msk.f32.gmra.mrb[18].mxu1 %vm267_vm0, %v3946_v29 }
  0x41   : > { %3267 = vmatprep.mubr.msk.f32.mxu1 %vm267_vm0, %v259_v32 }
  0x42   : > { %3248 = vmatmul.mubr.msk.f32.gmra.mrb[20].mxu0 %vm267_vm0, %v260_v35 }
  0x43   : > { %3250 = vmatprep.mubr.msk.f32.mxu0 %vm267_vm0, %v261_v36 }
  0x44   : > { %3268 = vmatmul.mubr.msk.f32.gmra.mrb[20].mxu1 %vm267_vm0, %v260_v35 }
  0x45   : > { %3270 = vmatprep.mubr.msk.f32.mxu1 %vm267_vm0, %v261_v36 }
  0x46   : > { %3251 = vmatmul.mubr.msk.f32.gmra.mrb[22].mxu0 %vm267_vm0, %v262_v37 }
  0x48   : > { %3271 = vmatmul.mubr.msk.f32.gmra.mrb[22].mxu1 %vm267_vm0, %v262_v37 }
  0xed   : > { %v3163_v44 = vpop.f32.mrb[0].mxu0  ;;  %v4035_v46 = vpop.f32.mrb[0].mxu1 }
  0xee   : > { %v358_v45 = vpop.f32.mrb[1].mxu0  ;;  %v468_v47 = vpop.f32.mrb[1].mxu1 }
  0xef   : > { %3277 = vmatprep.mubr.msk.f32.mxu0 %vm945_vm1, %v358_v45 }
  0xf1   : > { %v3166_v48 = vpop.f32.mrb[2].mxu0 }
  0xf2   : > { %v368_v49 = vpop.f32.mrb[3].mxu0 }
  0xf3   : > { %3284 = vmatprep.mubr.msk.f32.mxu1 %vm945_vm1, %v368_v49  ;;  %v4038_v50 = vpop.f32.mrb[2].mxu1 }
  0xf4   : > { %v4040_v51 = vpop.f32.mrb[3].mxu1 }
  0xf5   : > { %v3169_v52 = vpop.f32.mrb[4].mxu0 }
  0xf6   : > { %v378_v53 = vpop.f32.mrb[5].mxu0 }
  0xf7   : > { %v4042_v54 = vpop.f32.mrb[4].mxu1 }
  0xf8   : > { %v4044_v55 = vpop.f32.mrb[5].mxu1 }
  0xf9   : > { %v3172_v56 = vpop.f32.mrb[6].mxu0 }
  0xfa   : > { %v388_v57 = vpop.f32.mrb[7].mxu0 }
  0xfb   : > { %v4046_v58 = vpop.f32.mrb[6].mxu1 }
  0xfc   : > { %v4048_v59 = vpop.f32.mrb[7].mxu1 }
  0xfd   : > { %v3203_v60 = vpop.f32.mrb[8].mxu0 }
  0xfe   : > { %v577_v61 = vpop.f32.mrb[9].mxu0 }
  0xff   : > { %v3477_v63 = vpack.c.bf16 %v3203_v60, %v577_v61  ;;  %v3223_v0 = vpop.f32.mrb[8].mxu1 }
 0x100   : > { %v687_v1 = vpop.f32.mrb[9].mxu1 }
 0x101   : > { %v3206_v2 = vpop.f32.mrb[10].mxu0  ;;  %3479 = vmatprep.subr.msk.bf16.mxu0 %vm4052_vm2, %v3477_v63  ;;  %v3501_v3 = vpack.c.bf16 %v3223_v0, %v687_v1 }
 0x102   : > { %v587_v4 = vpop.f32.mrb[11].mxu0  ;;  %3482 = vmatpush3.bf16.xpose.msk.msra.mxu0 %vm4052_vm2, %v3477_v63 }
 0x103   : > { %v3483_v5 = vpack.c.bf16 %v3206_v2, %v587_v4  ;;  %v3226_v6 = vpop.f32.mrb[10].mxu1 }
 0x104   : > { %v697_v7 = vpop.f32.mrb[11].mxu1 }
 0x105   : > { %v3209_v8 = vpop.f32.mrb[12].mxu0  ;;  %3485 = vmatprep.subr.msk.bf16.mxu1 %vm4052_vm2, %v3483_v5  ;;  %v3507_v9 = vpack.c.bf16 %v3226_v6, %v697_v7 }
 0x106   : > { %v597_v10 = vpop.f32.mrb[13].mxu0  ;;  %3488 = vmatpush3.bf16.xpose.msk.msra.mxu1 %vm4052_vm2, %v3483_v5 }
 0x107   : > { %v3489_v11 = vpack.c.bf16 %v3209_v8, %v597_v10  ;;  %v3229_v12 = vpop.f32.mrb[12].mxu1 }
 0x108   : > { %v707_v13 = vpop.f32.mrb[13].mxu1 }
 0x109   : > { %v3212_v14 = vpop.f32.mrb[14].mxu0  ;;  %3278 = vmatmul.mubr.msk.f32.vlgmr.msra.gmra.mrb[24].mxu0 %vm945_vm1, %v3163_v44  ;;  %3491 = vmatprep.subr.msk.bf16.mxu0 %vm4052_vm2, %v3489_v11  ;;  %v3513_v15 = vpack.c.bf16 %v3229_v12, %v707_v13 }
 0x10a   : > { %v607_v16 = vpop.f32.mrb[15].mxu0  ;;  %3494 = vmatpush3.bf16.xpose.msk.msra.mxu0 %vm4052_vm2, %v3489_v11  ;;  %3291 = vmatprep.mubr.msk.f32.mxu0 %vm945_vm1, %v378_v53 }
 0x10b   : > { %v3495_v17 = vpack.c.bf16 %v3212_v14, %v607_v16  ;;  %3503 = vmatprep.subr.msk.bf16.mxu0 %vm4052_vm2, %v3501_v3  ;;  %v3232_v18 = vpop.f32.mrb[14].mxu1 }
 0x10c   : > { %v717_v19 = vpop.f32.mrb[15].mxu1 }
 0x10d   : > { %3285 = vmatmul.mubr.msk.f32.vlgmr.msra.gmra.mrb[24].mxu1 %vm945_vm1, %v3166_v48  ;;  %3497 = vmatprep.subr.msk.bf16.mxu1 %vm4052_vm2, %v3495_v17  ;;  %v3519_v20 = vpack.c.bf16 %v3232_v18, %v717_v19  ;;  %v3243_v21 = vpop.f32.mrb[16].mxu0 }
 0x10e   : > { %3500 = vmatpush3.bf16.xpose.msk.msra.mxu1 %vm4052_vm2, %v3495_v17  ;;  %3298 = vmatprep.mubr.msk.f32.mxu1 %vm945_vm1, %v388_v57  ;;  %v796_v22 = vpop.f32.mrb[17].mxu0 }
 0x10f   : > { %3509 = vmatprep.subr.msk.bf16.mxu1 %vm4052_vm2, %v3507_v9  ;;  %v3525_v23 = vpack.c.bf16 %v3243_v21, %v796_v22  ;;  %v3263_v24 = vpop.f32.mrb[16].mxu1 }
 0x110   : > { %v906_v25 = vpop.f32.mrb[17].mxu1 }
 0x111   : > { %3292 = vmatmul.mubr.msk.f32.vlgmr.msra.gmra.mrb[26].mxu0 %vm945_vm1, %v3169_v52  ;;  %v3246_v26 = vpop.f32.mrb[18].mxu0  ;;  %v4081_v27 = vpack.c.bf16 %v3263_v24, %v906_v25 }
 0x112   : > { %3506 = vmatpush3.bf16.xpose.msk.msra.mxu0 %vm4052_vm2, %v3501_v3  ;;  %3305 = vmatprep.mubr.msk.f32.mxu0 %vm945_vm1, %v468_v47  ;;  %v806_v28 = vpop.f32.mrb[19].mxu0 }
 0x113   : > { %3515 = vmatprep.subr.msk.bf16.mxu0 %vm4052_vm2, %v3513_v15  ;;  %v3529_v29 = vpack.c.bf16 %v3246_v26, %v806_v28  ;;  %v3266_v30 = vpop.f32.mrb[18].mxu1 }
 0x114   : > { %v916_v31 = vpop.f32.mrb[19].mxu1 }
 0x115   : > { %3299 = vmatmul.mubr.msk.f32.vlgmr.msra.gmra.mrb[26].mxu1 %vm945_vm1, %v3172_v56  ;;  %v3249_v32 = vpop.f32.mrb[20].mxu0  ;;  %v4089_v33 = vpack.c.bf16 %v3266_v30, %v916_v31 }
 0x116   : > { %3512 = vmatpush3.bf16.xpose.msk.msra.mxu1 %vm4052_vm2, %v3507_v9  ;;  %3312 = vmatprep.mubr.msk.f32.mxu1 %vm945_vm1, %v4040_v51  ;;  %v816_v34 = vpop.f32.mrb[21].mxu0 }
 0x117   : > { %3521 = vmatprep.subr.msk.bf16.mxu1 %vm4052_vm2, %v3519_v20  ;;  %v4097_v35 = vpack.c.bf16 %v3249_v32, %v816_v34  ;;  %v3269_v36 = vpop.f32.mrb[20].mxu1 }
 0x118   : > { %v926_v40 = vpop.f32.mrb[21].mxu1 }
 0x119   : > { %3306 = vmatmul.mubr.msk.f32.vlgmr.msra.gmra.mrb[28].mxu0 %vm945_vm1, %v4035_v46  ;;  %v3252_v37 = vpop.f32.mrb[22].mxu0  ;;  %v4119_v41 = vpack.c.bf16 %v3269_v36, %v926_v40 }
 0x11a   : > { %3518 = vmatpush3.bf16.xpose.msk.msra.mxu0 %vm4052_vm2, %v3513_v15  ;;  %3319 = vmatprep.mubr.msk.f32.mxu0 %vm945_vm1, %v4044_v55  ;;  %v826_v38 = vpop.f32.mrb[23].mxu0 }
 0x11b   : > { %3526 = vmatprep.subr.bf16.mxu0 %v3525_v23  ;;  %v4105_v39 = vpack.c.bf16 %v3252_v37, %v826_v38  ;;  %v3272_v42 = vpop.f32.mrb[22].mxu1 }
 0x11c   : > { %v936_v43 = vpop.f32.mrb[23].mxu1 }
 0x11d   : > { %3313 = vmatmul.mubr.msk.f32.vlgmr.msra.gmra.mrb[28].mxu1 %vm945_vm1, %v4038_v50  ;;  %v4121_v44 = vpack.c.bf16 %v3272_v42, %v936_v43 }
 0x11e   : > { %3524 = vmatpush3.bf16.xpose.msk.msra.mxu1 %vm4052_vm2, %v3519_v20  ;;  %3326 = vmatprep.mubr.msk.f32.mxu1 %vm945_vm1, %v4048_v59 }
 0x11f   : > { %3530 = vmatprep.subr.bf16.mxu1 %v3529_v29 }
 0x121   : > { %3320 = vmatmul.mubr.msk.f32.vlgmr.msra.gmra.mrb[30].mxu0 %vm945_vm1, %v4042_v54 }
 0x122   : > { %3528 = vmatpush3.bf16.msra.mxu0 %v3525_v23 }
 0x123   : > { %3534 = vmatprep.subr.bf16.mxu0 %v4097_v35 }
 0x125   : > { %3327 = vmatmul.mubr.msk.f32.vlgmr.msra.gmra.mrb[30].mxu1 %vm945_vm1, %v4046_v58 }
 0x126   : > { %3532 = vmatpush3.bf16.msra.mxu1 %v3529_v29 }
 0x127   : > { %3538 = vmatprep.subr.bf16.mxu1 %v4105_v39 }
 0x1dc   : > { %v3279_v45 = vpop.f32.mrb[24].mxu0 }
 0x1dd   : > { %v4123_v46 = vmul.f32 0.25, %v3279_v45  ;;  %v1024_v47 = vpop.f32.mrb[25].mxu0 }
 0x1de   : > { %v4125_v48 = vmul.f32 0.25, %v1024_v47 }
 0x1df   : > { %v1661_v49 = vsel %vm945_vm1, %v4123_v46, -inf }
 0x1e0   : > { %v3286_v50 = vpop.f32.mrb[24].mxu1  ;;  %1662 = vmax.xlane.f32.xlu0 %v1661_v49  ;;  %v1658_v53 = vsel %vm945_vm1, %v4125_v48, -inf }
 0x1e1   : > { %v1111_v51 = vpop.f32.mrb[25].mxu1  ;;  %v4129_v52 = vmul.f32 0.25, %v3286_v50 }
 0x1e2   : > { %v4135_v57 = vmul.f32 0.25, %v1111_v51 }
 0x1e3   : > { %v1667_v59 = vsel %vm945_vm1, %v4129_v52, -inf }
 0x1e4   : > { %1659 = vmax.xlane.f32.xlu0 %v1658_v53  ;;  %v3293_v54 = vpop.f32.mrb[26].mxu0  ;;  %v1664_v1 = vsel %vm945_vm1, %v4135_v57, -inf }
 0x1e5   : > { %v4133_v55 = vmul.f32 0.25, %v3293_v54  ;;  %v1198_v56 = vpop.f32.mrb[27].mxu0 }
 0x1e6   : > { %v4137_v58 = vmul.f32 0.25, %v1198_v56 }
 0x1e7   : > { %v1673_v60 = vsel %vm945_vm1, %v4133_v55, -inf }
 0x1e8   : > { %v3300_v61 = vpop.f32.mrb[26].mxu1  ;;  %1668 = vmax.xlane.f32.xlu0 %v1667_v59  ;;  %1674 = vmax.xlane.f32.xlu1 %v1673_v60  ;;  %v1670_v2 = vsel %vm945_vm1, %v4137_v58, -inf }
 0x1e9   : > { %v1285_v63 = vpop.f32.mrb[27].mxu1  ;;  %v4159_v12 = vmul.f32 0.25, %v3300_v61 }
 0x1ea   : > { %v4143_v0 = vmul.f32 0.25, %v1285_v63 }
 0x1eb   : > { %v1679_v20 = vsel %vm945_vm1, %v4159_v12, -inf }
 0x1ec   : > { %1665 = vmax.xlane.f32.xlu0 %v1664_v1  ;;  %1671 = vmax.xlane.f32.xlu1 %v1670_v2  ;;  %v3307_v3 = vpop.f32.mrb[28].mxu0  ;;  %v1676_v6 = vsel %vm945_vm1, %v4143_v0, -inf }
 0x1ed   : > { %v1372_v4 = vpop.f32.mrb[29].mxu0  ;;  %v4153_v7 = vmul.f32 0.25, %v3307_v3 }
 0x1ee   : > { %v4149_v5 = vmul.f32 0.25, %v1372_v4 }
 0x1ef   : > { %v1685_v15 = vsel %vm945_vm1, %v4153_v7, -inf }
 0x1f0   : > { %v3314_v8 = vpop.f32.mrb[28].mxu1  ;;  %1677 = vmax.xlane.f32.xlu0 %v1676_v6  ;;  %v1682_v9 = vsel %vm945_vm1, %v4149_v5, -inf }
 0x1f1   : > { %v1459_v10 = vpop.f32.mrb[29].mxu1  ;;  %1683 = vmax.xlane.f32.xlu1 %v1682_v9  ;;  %v4167_v18 = vmul.f32 0.25, %v3314_v8 }
 0x1f2   : > { %v4157_v11 = vmul.f32 0.25, %v1459_v10 }
 0x1f3   : > { %v1691_v25 = vsel %vm945_vm1, %v4167_v18, -inf }
 0x1f4   : > { %v3321_v13 = vpop.f32.mrb[30].mxu0  ;;  %v1688_v14 = vsel %vm945_vm1, %v4157_v11, -inf }
 0x1f5   : > { %1689 = vmax.xlane.f32.xlu0 %v1688_v14  ;;  %1686 = vmax.xlane.f32.xlu1 %v1685_v15  ;;  %v1546_v16 = vpop.f32.mrb[31].mxu0  ;;  %v4175_v24 = vmul.f32 0.25, %v3321_v13 }
 0x1f6   : > { %v4165_v17 = vmul.f32 0.25, %v1546_v16 }
 0x1f7   : > { %v1697_v29 = vsel %vm945_vm1, %v4175_v24, -inf }
 0x1f8   : > { %v3328_v19 = vpop.f32.mrb[30].mxu1  ;;  %v1694_v21 = vsel %vm945_vm1, %v4165_v17, -inf }
 0x1f9   : > { %v1633_v22 = vpop.f32.mrb[31].mxu1  ;;  %1680 = vmax.xlane.f32.xlu1 %v1679_v20  ;;  %1695 = vmax.xlane.f32.xlu0 %v1694_v21  ;;  %v4181_v28 = vmul.f32 0.25, %v3328_v19 }
 0x1fa   : > { %v4173_v23 = vmul.f32 0.25, %v1633_v22 }
 0x1fb   : > { %v1703_v30 = vsel %vm945_vm1, %v4181_v28, -inf }
 0x1fc   : > { %v1700_v26 = vsel %vm945_vm1, %v4173_v23, -inf }
 0x1fd   : > { %1692 = vmax.xlane.f32.xlu1 %v1691_v25  ;;  %1701 = vmax.xlane.f32.xlu0 %v1700_v26 }
 0x201   : > { %1698 = vmax.xlane.f32.xlu1 %v1697_v29 }
 0x205   : > { %1704 = vmax.xlane.f32.xlu1 %v1703_v30 }
 0x26d   : > { %v1663_v31 = vpop.xlane.xlu0 %1662 }
 0x26e   : > { %v1707_v32 = vsub.f32 %v4123_v46, %v1663_v31 }
 0x270   : > { %v1724_v34 = vmul.f32 1.442695, %v1707_v32 }
 0x271   : > { %v1660_v36 = vpop.xlane.xlu0 %1659 }
 0x272   : > { %3653 = vpow2.f32 %v1724_v34  ;;  %v1706_v37 = vsub.f32 %v4125_v48, %v1660_v36 }
 0x274   : > { %v1722_v38 = vmul.f32 1.442695, %v1706_v37 }
 0x275   : > { %v1669_v40 = vpop.xlane.xlu0 %1668  ;;  %v1675_v42 = vpop.xlane.xlu1 %1674 }
 0x276   : > { %3655 = vpow2.f32 %v1722_v38  ;;  %v1711_v43 = vsub.f32 %v4133_v55, %v1675_v42  ;;  %v1709_v53 = vsub.f32 %v4129_v52, %v1669_v40 }
 0x278   : > { %v1732_v45 = vmul.f32 1.442695, %v1711_v43 }
 0x279   : > { %v1666_v47 = vpop.xlane.xlu0 %1665  ;;  %v1672_v49 = vpop.xlane.xlu1 %1671 }
 0x27a   : > { %v1708_v50 = vsub.f32 %v4135_v57, %v1666_v47  ;;  %v1710_v51 = vsub.f32 %v4137_v58, %v1672_v49  ;;  %3657 = vpow2.f32 %v1732_v45  ;;  %v1728_v58 = vmul.f32 1.442695, %v1709_v53 }
 0x27c   : > { %v4192_v46 = vpop.eup %3653  ;;  %v1726_v54 = vmul.f32 1.442695, %v1708_v50  ;;  %v1730_v48 = vmul.f32 1.442695, %v1710_v51 }
 0x27d   : > { %v1678_v56 = vpop.xlane.xlu0 %1677  ;;  %v1757_v59 = vsel %vm945_vm1, %v4192_v46, 0.0 }
 0x27e   : > { %3659 = vpow2.f32 %v1726_v54  ;;  %v1684_v55 = vpop.xlane.xlu1 %1683  ;;  %1758 = vadd.xlane.f32.xlu1 %v1757_v59  ;;  %v1712_v60 = vsub.f32 %v4143_v0, %v1678_v56 }
 0x27f   : > { %v1714_v57 = vsub.f32 %v4149_v5, %v1684_v55  ;;  %3661 = vpow2.f32 %v1730_v48 }
 0x280   : > { %v4199_v61 = vpop.eup %3655  ;;  %v1734_v3 = vmul.f32 1.442695, %v1712_v60 }
 0x281   : > { %v1738_v63 = vmul.f32 1.442695, %v1714_v57  ;;  %v1754_v52 = vsel %vm945_vm1, %v4199_v61, 0.0 }
 0x282   : > { %v1690_v1 = vpop.xlane.xlu0 %1689  ;;  %v1687_v2 = vpop.xlane.xlu1 %1686  ;;  %1755 = vadd.xlane.f32.xlu0 %v1754_v52 }
 0x283   : > { %3663 = vpow2.f32 %v1738_v63  ;;  %v1715_v4 = vsub.f32 %v4153_v7, %v1687_v2  ;;  %v1716_v0 = vsub.f32 %v4157_v11, %v1690_v1 }
 0x284   : > { %3665 = vpow2.f32 %v1728_v58  ;;  %v4205_v6 = vpop.eup %3657 }
 0x285   : > { %v1740_v5 = vmul.f32 1.442695, %v1715_v4  ;;  %v1769_v9 = vsel %vm945_vm1, %v4205_v6, 0.0  ;;  %3667 = vpow2.f32 %v1734_v3  ;;  %v1742_v15 = vmul.f32 1.442695, %v1716_v0 }
 0x286   : > { %v1681_v8 = vpop.xlane.xlu1 %1680  ;;  %v1696_v10 = vpop.xlane.xlu0 %1695  ;;  %1770 = vadd.xlane.f32.xlu1 %v1769_v9 }
 0x287   : > { %v1713_v13 = vsub.f32 %v4159_v12, %v1681_v8  ;;  %3669 = vpow2.f32 %v1740_v5  ;;  %v1718_v7 = vsub.f32 %v4165_v17, %v1696_v10 }
 0x288   : > { %v4210_v14 = vpop.eup %3659 }
 0x289   : > { %v1736_v16 = vmul.f32 1.442695, %v1713_v13  ;;  %v1760_v11 = vsel %vm945_vm1, %v4210_v14, 0.0  ;;  %v4215_v19 = vpop.eup %3661  ;;  %v1746_v12 = vmul.f32 1.442695, %v1718_v7 }
 0x28a   : > { %v1693_v20 = vpop.xlane.xlu1 %1692  ;;  %1761 = vadd.xlane.f32.xlu0 %v1760_v11  ;;  %v1702_v21 = vpop.xlane.xlu0 %1701  ;;  %v1766_v17 = vsel %vm945_vm1, %v4215_v19, 0.0 }
 0x28b   : > { %3671 = vpow2.f32 %v1736_v16  ;;  %v1717_v22 = vsub.f32 %v4167_v18, %v1693_v20  ;;  %v1720_v25 = vsub.f32 %v4173_v23, %v1702_v21 }
 0x28c   : > { %3673 = vpow2.f32 %v1742_v15 }
 0x28d   : > { %v4219_v26 = vpop.eup %3663  ;;  %v1744_v29 = vmul.f32 1.442695, %v1717_v22  ;;  %v1750_v34 = vmul.f32 1.442695, %v1720_v25 }
 0x28e   : > { %v4223_v30 = vpop.eup %3665  ;;  %v1699_v31 = vpop.xlane.xlu1 %1698  ;;  %1767 = vadd.xlane.f32.xlu0 %v1766_v17  ;;  %v1778_v32 = vsel %vm945_vm1, %v4219_v26, 0.0 }
 0x28f   : > { %3675 = vpow2.f32 %v1744_v29  ;;  %v1719_v18 = vsub.f32 %v4175_v24, %v1699_v31  ;;  %1779 = vadd.xlane.f32.xlu1 %v1778_v32  ;;  %v4228_v23 = vpop.eup %3667  ;;  %v1763_v37 = vsel %vm945_vm1, %v4223_v30, 0.0 }
 0x290   : > { %3677 = vpow2.f32 %v1746_v12  ;;  %v1772_v47 = vsel %vm945_vm1, %v4228_v23, 0.0 }
 0x291   : > { %v1748_v36 = vmul.f32 1.442695, %v1719_v18  ;;  %v4232_v38 = vpop.eup %3669 }
 0x292   : > { %v1705_v40 = vpop.xlane.xlu1 %1704  ;;  %1764 = vadd.xlane.f32.xlu0 %v1763_v37  ;;  %v1781_v43 = vsel %vm945_vm1, %v4232_v38, 0.0 }
 0x293   : > { %3679 = vpow2.f32 %v1748_v36  ;;  %v1721_v42 = vsub.f32 %v4181_v28, %v1705_v40  ;;  %1782 = vadd.xlane.f32.xlu1 %v1781_v43 }
 0x294   : > { %3681 = vpow2.f32 %v1750_v34 }
 0x295   : > { %v4237_v24 = vpop.eup %3671  ;;  %v1752_v45 = vmul.f32 1.442695, %v1721_v42 }
 0x296   : > { %v4241_v49 = vpop.eup %3673  ;;  %1773 = vadd.xlane.f32.xlu0 %v1772_v47  ;;  %v1775_v50 = vsel %vm945_vm1, %v4237_v24, 0.0  ;;  %v2482_v47 = vld [vmem:[%s4443_s4] sm:$0xff] }
 0x297   : > { %3683 = vpow2.f32 %v1752_v45  ;;  %1776 = vadd.xlane.f32.xlu1 %v1775_v50  ;;  %v1784_v51 = vsel %vm945_vm1, %v4241_v49, 0.0  ;;  %v3781_v50 = vmov 0  }
 0x298   : > { %3652 = vset.pattern.permute.xlu1 %v3781_v50  ;;  %3651 = vset.pattern.permute.xlu0 %v3781_v50 }
 0x299   : > { %v4245_v28 = vpop.eup %3675 }
 0x29a   : > { %v4249_v53 = vpop.eup %3677  ;;  %1785 = vadd.xlane.f32.xlu0 %v1784_v51  ;;  %v1787_v54 = vsel %vm945_vm1, %v4245_v28, 0.0  ;;  %v2735_v51 = vld [vmem:[%s4444_s5 + $0x10] sm:$0xff] }
 0x29b   : > { %1788 = vadd.xlane.f32.xlu1 %v1787_v54  ;;  %v1790_v56 = vsel %vm945_vm1, %v4249_v53, 0.0 }
 0x29d   : > { %v4253_v48 = vpop.eup %3679 }
 0x29e   : > { %v4257_v59 = vpop.eup %3681  ;;  %1791 = vadd.xlane.f32.xlu0 %v1790_v56  ;;  %v1793_v55 = vsel %vm945_vm1, %v4253_v48, 0.0 }
 0x29f   : > { %1794 = vadd.xlane.f32.xlu1 %v1793_v55  ;;  %v1796_v57 = vsel %vm945_vm1, %v4257_v59, 0.0 }
 0x2a1   : > { %v4261_v60 = vpop.eup %3683 }
 0x2a2   : > { %1797 = vadd.xlane.f32.xlu0 %v1796_v57  ;;  %v1799_v58 = vsel %vm945_vm1, %v4261_v60, 0.0 }
 0x2a3   : > { %1800 = vadd.xlane.f32.xlu1 %v1799_v58 }
 0x30b   : > { %v1759_v63 = vpop.xlane.xlu1 %1758 }
 0x30c   : > { %3685 = vrcp.f32 %v1759_v63 }
 0x30f   : > { %v1756_v52 = vpop.xlane.xlu0 %1755 }
 0x310   : > { %3687 = vrcp.f32 %v1756_v52 }
 0x313   : > { %v1771_v2 = vpop.xlane.xlu1 %1770 }
 0x316   : > { %v3686_v3 = vpop.eup %3685 }
 0x317   : > { %v1762_v1 = vpop.xlane.xlu0 %1761  ;;  %v1819_v8 = vmul.f32 %v3686_v3, %v4192_v46 }
 0x318   : > { %3689 = vrcp.f32 %v1762_v1 }
 0x319   : > { %3691 = vrcp.f32 %v1771_v2 }
 0x31a   : > { %v3688_v4 = vpop.eup %3687 }
 0x31b   : > { %v1768_v0 = vpop.xlane.xlu0 %1767  ;;  %v1818_v5 = vmul.f32 %v3688_v4, %v4199_v61 }
 0x31c   : > { %3693 = vrcp.f32 %v1768_v0  ;;  %v1780_v9 = vpop.xlane.xlu1 %1779 }
 0x31d   : > { %3695 = vrcp.f32 %v1780_v9  ;;  %3333 = vmatprep.mubr.msk.f32.mxu0 %vm945_vm1, %v1818_v5 }
 0x31e   : > { %3334 = vmatmul.mubr.msk.f32.vlgmr.msra.gmra.mrb[32].mxu0 %vm945_vm1, %v1819_v8 }
 0x31f   : > { %3536 = vmatpush3.bf16.msra.mxu0 %v4097_v35  ;;  %v1765_v10 = vpop.xlane.xlu0 %1764 }
 0x320   : > { %3542 = vmatprep.subr.bf16.mxu0 %v4081_v27  ;;  %3697 = vrcp.f32 %v1765_v10  ;;  %v1783_v13 = vpop.xlane.xlu1 %1782 }
 0x321   : > { %3699 = vrcp.f32 %v1783_v13 }
 0x322   : > { %v3690_v15 = vpop.eup %3689 }
 0x323   : > { %v1774_v7 = vpop.xlane.xlu0 %1773  ;;  %v1820_v61 = vmul.f32 %v3690_v15, %v4210_v14  ;;  %v3692_v46 = vpop.eup %3691 }
 0x324   : > { %3701 = vrcp.f32 %v1774_v7  ;;  %v1777_v16 = vpop.xlane.xlu1 %1776  ;;  %v1823_v22 = vmul.f32 %v3692_v46, %v4205_v6 }
 0x325   : > { %3340 = vmatprep.mubr.msk.f32.mxu1 %vm945_vm1, %v1820_v61  ;;  %3703 = vrcp.f32 %v1777_v16  ;;  %v2483_v16 = vld [vmem:[%s4443_s4 + $0x8] sm:$0xff] }
 0x326   : > { %v3694_v11 = vpop.eup %3693 }
 0x327   : > { %v3696_v20 = vpop.eup %3695  ;;  %v1786_v21 = vpop.xlane.xlu0 %1785  ;;  %v1822_v35 = vmul.f32 %v3694_v11, %v4215_v19  ;;  %v2484_v11 = vld [vmem:[%s4443_s4 + $0x10] sm:$0xff] }
 0x328   : > { %3705 = vrcp.f32 %v1786_v21  ;;  %v1826_v12 = vmul.f32 %v3696_v20, %v4219_v26  ;;  %v1789_v25 = vpop.xlane.xlu1 %1788  ;;  %v2485_v20 = vld [vmem:[%s4443_s4 + $0x18] sm:$0xff]  ;;  %v2959_v21 = vld [vmem:[%s4443_s4 + $0x28] sm:$0xff] }
 0x329   : > { %3347 = vmatprep.mubr.msk.f32.mxu0 %vm945_vm1, %v1822_v35  ;;  %3707 = vrcp.f32 %v1789_v25  ;;  %v2960_v35 = vld [vmem:[%s4443_s4 + $0x30] sm:$0xff] }
 0x32a   : > { %v3698_v14 = vpop.eup %3697  ;;  %3348 = vmatmul.mubr.msk.f32.vlgmr.msra.gmra.mrb[34].mxu0 %vm945_vm1, %v1823_v22  ;;  %v2961_v22 = vld [vmem:[%s4443_s4 + $0x38] sm:$0xff] }
 0x32b   : > { %v1821_v29 = vmul.f32 %v3698_v14, %v4223_v30  ;;  %3544 = vmatpush3.bf16.msra.mxu0 %v4081_v27  ;;  %3361 = vmatprep.mubr.msk.f32.mxu0 %vm945_vm1, %v1826_v12  ;;  %v1792_v17 = vpop.xlane.xlu0 %1791  ;;  %v3700_v19 = vpop.eup %3699 }
 0x32c   : > { %3550 = vmatprep.subr.bf16.mxu0 %v4119_v41  ;;  %3709 = vrcp.f32 %v1792_v17  ;;  %v1827_v6 = vmul.f32 %v3700_v19, %v4232_v38  ;;  %v1795_v26 = vpop.xlane.xlu1 %1794 }
 0x32d   : > { %3341 = vmatmul.mubr.msk.f32.vlgmr.msra.gmra.mrb[32].mxu1 %vm945_vm1, %v1821_v29  ;;  %3711 = vrcp.f32 %v1795_v26 }
 0x32e   : > { %v3702_v31 = vpop.eup %3701  ;;  %3540 = vmatpush3.bf16.msra.mxu1 %v4105_v39  ;;  %3362 = vmatmul.mubr.msk.f32.vlgmr.msra.gmra.mrb[36].mxu0 %vm945_vm1, %v1827_v6 }
 0x32f   : > { %3546 = vmatprep.subr.bf16.mxu1 %v4089_v33  ;;  %v1798_v27 = vpop.xlane.xlu0 %1797  ;;  %v1824_v30 = vmul.f32 %v3702_v31, %v4228_v23  ;;  %v3704_v32 = vpop.eup %3703  ;;  %3552 = vmatpush3.bf16.msra.mxu0 %v4119_v41 }
 0x330   : > { %3713 = vrcp.f32 %v1798_v27  ;;  %v1825_v18 = vmul.f32 %v3704_v32, %v4237_v24  ;;  %v1801_v34 = vpop.xlane.xlu1 %1800 }
 0x331   : > { %3354 = vmatprep.mubr.msk.f32.mxu1 %vm945_vm1, %v1824_v30  ;;  %3715 = vrcp.f32 %v1801_v34 }
 0x332   : > { %v3706_v36 = vpop.eup %3705  ;;  %3355 = vmatmul.mubr.msk.f32.vlgmr.msra.gmra.mrb[34].mxu1 %vm945_vm1, %v1825_v18 }
 0x333   : > { %v1828_v39 = vmul.f32 %v3706_v36, %v4241_v49  ;;  %v3708_v37 = vpop.eup %3707  ;;  %3548 = vmatpush3.bf16.msra.mxu1 %v4089_v33  ;;  %v2734_v49 = vld [vmem:[%s4444_s5 + $0x8] sm:$0xff] }
 0x334   : > { %v1829_v23 = vmul.f32 %v3708_v37, %v4245_v28  ;;  %3554 = vmatprep.subr.bf16.mxu1 %v4121_v44  ;;  %v2733_v28 = vld [vmem:[%s4444_s5] sm:$0xff]  ;;  %2744 = vperm.xlu1 %3652, %v2734_v49  }
 0x335   : > { %3368 = vmatprep.mubr.msk.f32.mxu1 %vm945_vm1, %v1828_v39  ;;  %2739 = vperm.xlu0 %3651, %v2733_v28  }
 0x336   : > { %v3710_v41 = vpop.eup %3709  ;;  %3369 = vmatmul.mubr.msk.f32.vlgmr.msra.gmra.mrb[36].mxu1 %vm945_vm1, %v1829_v23 }
 0x337   : > { %v1830_v38 = vmul.f32 %v3710_v41, %v4249_v53  ;;  %v3712_v40 = vpop.eup %3711  ;;  %3556 = vmatpush3.bf16.msra.mxu1 %v4121_v44  ;;  %v2958_v44 = vld [vmem:[%s4443_s4 + $0x20] sm:$0xff]  ;;  %v2736_v53 = vld [vmem:[%s4444_s5 + $0x18] sm:$0xff] }
 0x338   : > { %v1831_v42 = vmul.f32 %v3712_v40, %v4253_v48  ;;  %2749 = vperm.xlu1 %3652, %v2735_v51  }
 0x339   : > { %3375 = vmatprep.mubr.msk.f32.mxu0 %vm945_vm1, %v1830_v38 }
 0x33a   : > { %v3714_v43 = vpop.eup %3713  ;;  %3376 = vmatmul.mubr.msk.f32.vlgmr.msra.gmra.mrb[38].mxu0 %vm945_vm1, %v1831_v42 }
 0x33b   : > { %v1832_v33 = vmul.f32 %v3714_v43, %v4257_v59  ;;  %v3716_v24 = vpop.eup %3715  ;;  %3423 = vmatprep.mubr.msk.f32.mxu0 %vm945_vm1, %v2482_v47 }
 0x33c   : > { %v1833_v45 = vmul.f32 %v3716_v24, %v4261_v60  ;;  %2754 = vperm.xlu1 %3652, %v2736_v53  }
 0x33d   : > { %3382 = vmatprep.mubr.msk.f32.mxu1 %vm945_vm1, %v1832_v33 }
 0x33e   : > { %3383 = vmatmul.mubr.msk.f32.vlgmr.msra.gmra.mrb[38].mxu1 %vm945_vm1, %v1833_v45 }
 0x33f   : > { %3401 = vmatprep.mubr.msk.f32.mxu1 %vm945_vm1, %v2958_v44 }
 0x3b3   : > { %v2745_v25 = vpop.permute.xlu1 %2744 }
 0x3b4   : > { %v2740_v31 = vpop.permute.xlu0 %2739 }
 0x3b7   : > { %v2750_v19 = vpop.permute.xlu1 %2749 }
 0x3bb   : > { %v2755_v37 = vpop.permute.xlu1 %2754 }
 0x3f1   : > { %v3335_v54 = vpop.f32.mrb[32].mxu0 }
 0x3f2   : > { %v1906_v48 = vpop.f32.mrb[33].mxu0 }
 0x3f3   : > { %v3581_v56 = vpack.c.bf16 %v3335_v54, %v1906_v48 }
 0x3f5   : > { %3583 = vmatprep.subr.msk.bf16.mxu0 %vm4052_vm2, %v3581_v56 }
 0x3f6   : > { %3586 = vmatpush3.bf16.xpose.msk.msra.mxu0 %vm4052_vm2, %v3581_v56 }
 0x3fd   : > { %v3349_v59 = vpop.f32.mrb[34].mxu0 }
 0x3fe   : > { %v2068_v55 = vpop.f32.mrb[35].mxu0 }
 0x3ff   : > { %v3593_v60 = vpack.c.bf16 %v3349_v59, %v2068_v55 }
 0x400   : > { %v3342_v57 = vpop.f32.mrb[32].mxu1 }
 0x401   : > { %v1987_v58 = vpop.f32.mrb[33].mxu1  ;;  %v3363_v52 = vpop.f32.mrb[36].mxu0 }
 0x402   : > { %v3587_v63 = vpack.c.bf16 %v3342_v57, %v1987_v58  ;;  %v2230_v1 = vpop.f32.mrb[37].mxu0 }
 0x403   : > { %v3557_v2 = vpack.c.bf16 %v3363_v52, %v2230_v1 }
 0x404   : > { %3589 = vmatprep.subr.msk.bf16.mxu0 %vm4052_vm2, %v3587_v63 }
 0x405   : > { %3592 = vmatpush3.bf16.xpose.msk.msra.mxu0 %vm4052_vm2, %v3587_v63  ;;  %v3356_v3 = vpop.f32.mrb[34].mxu1  ;;  %3559 = vmatprep.subr.msk.bf16.mxu1 %vm4052_vm2, %v3557_v2 }
 0x406   : > { %3595 = vmatprep.subr.msk.bf16.mxu0 %vm4052_vm2, %v3593_v60  ;;  %v2149_v4 = vpop.f32.mrb[35].mxu1  ;;  %3562 = vmatpush3.bf16.xpose.msk.msra.mxu1 %vm4052_vm2, %v3557_v2 }
 0x407   : > { %v3599_v0 = vpack.c.bf16 %v3356_v3, %v2149_v4 }
 0x409   : > { %v3370_v5 = vpop.f32.mrb[36].mxu1 }
 0x40a   : > { %v2311_v8 = vpop.f32.mrb[37].mxu1 }
 0x40b   : > { %v3563_v9 = vpack.c.bf16 %v3370_v5, %v2311_v8 }
 0x40d   : > { %3598 = vmatpush3.bf16.xpose.msk.msra.mxu0 %vm4052_vm2, %v3593_v60  ;;  %v3377_v10 = vpop.f32.mrb[38].mxu0  ;;  %3565 = vmatprep.subr.msk.bf16.mxu1 %vm4052_vm2, %v3563_v9 }
 0x40e   : > { %3601 = vmatprep.subr.msk.bf16.mxu0 %vm4052_vm2, %v3599_v0  ;;  %v2392_v13 = vpop.f32.mrb[39].mxu0  ;;  %3568 = vmatpush3.bf16.xpose.msk.msra.mxu1 %vm4052_vm2, %v3563_v9 }
 0x40f   : > { %v3569_v15 = vpack.c.bf16 %v3377_v10, %v2392_v13 }
 0x411   : > { %v3384_v7 = vpop.f32.mrb[38].mxu1  ;;  %3571 = vmatprep.subr.msk.bf16.mxu1 %vm4052_vm2, %v3569_v15 }
 0x412   : > { %v2473_v61 = vpop.f32.mrb[39].mxu1 }
 0x413   : > { %v3575_v46 = vpack.c.bf16 %v3384_v7, %v2473_v61 }
 0x415   : > { %3604 = vmatpush3.bf16.xpose.msk.msra.mxu0 %vm4052_vm2, %v3599_v0 }
 0x416   : > { %3574 = vmatpush3.bf16.xpose.msk.msra.mxu1 %vm4052_vm2, %v3569_v15 }
 0x417   : > { %3577 = vmatprep.subr.msk.bf16.mxu1 %vm4052_vm2, %v3575_v46 }
 0x41c   : > { %3424 = vmatmul.mubr.msk.f32.vlgmr.msra.gmra.mrb[40].mxu0 %vm945_vm1, %v2483_v16 }
 0x41d   : > { %3426 = vmatprep.mubr.msk.f32.mxu0 %vm945_vm1, %v2484_v11 }
 0x41e   : > { %3580 = vmatpush3.bf16.xpose.msk.msra.mxu1 %vm4052_vm2, %v3575_v46 }
 0x420   : > { %3427 = vmatmul.mubr.msk.f32.gmra.mrb[42].mxu0 %vm945_vm1, %v2485_v20 }
 0x425   : > { %3402 = vmatmul.mubr.msk.f32.vlgmr.msra.gmra.mrb[40].mxu1 %vm945_vm1, %v2959_v21 }
 0x426   : > { %3404 = vmatprep.mubr.msk.f32.mxu1 %vm945_vm1, %v2960_v35 }
 0x429   : > { %3405 = vmatmul.mubr.msk.f32.gmra.mrb[42].mxu1 %vm945_vm1, %v2961_v22 }
 0x4ef   : > { %v3425_v62 = vpop.f32.mrb[40].mxu0 }
 0x4f0   : > { %v2714_v12 = vpop.f32.mrb[41].mxu0 }
 0x4f3   : > { %v3428_v14 = vpop.f32.mrb[42].mxu0 }
 0x4f4   : > { %v2724_v29 = vpop.f32.mrb[43].mxu0 }
 0x4f8   : > { %v3403_v17 = vpop.f32.mrb[40].mxu1 }
 0x4f9   : > { %v2720_v6 = vadd.f32 %v3425_v62, %v3403_v17  ;;  %v2593_v26 = vpop.f32.mrb[41].mxu1 }
 0x4fa   : > { %v2715_v27 = vadd.f32 %v2714_v12, %v2593_v26 }
 0x4fb   : > { %v2758_v30 = vadd.f32 %v2745_v25, %v2720_v6 }
 0x4fc   : > { %v3406_v32 = vpop.f32.mrb[42].mxu1  ;;  %v2757_v18 = vadd.f32 %v2740_v31, %v2715_v27 }
 0x4fd   : > { %2763 = vst.msk [vmem:[%s247_s14 + $0x8] sm:$0xff] %vm2761_vm3, %v2758_v30  ;;  %v2730_v34 = vadd.f32 %v3428_v14, %v3406_v32  ;;  %v2603_v36 = vpop.f32.mrb[43].mxu1 }
 0x4fe   : > { %v2725_v39 = vadd.f32 %v2724_v29, %v2603_v36  ;;  %2762 = vst.msk [vmem:[%s247_s14] sm:$0xff] %vm2761_vm3, %v2757_v18 }
 0x4ff   : > { %v2760_v23 = vadd.f32 %v2755_v37, %v2730_v34 }
 0x500   : > { %v2759_v41 = vadd.f32 %v2750_v19, %v2725_v39 }
 0x501   : > { %2765 = vst.msk [vmem:[%s247_s14 + $0x18] sm:$0xff] %vm2761_vm3, %v2760_v23 }
 0x502   : > { %2764 = vst.msk [vmem:[%s247_s14 + $0x10] sm:$0xff] %vm2761_vm3, %v2759_v41 }
 0x503   : > { %3730 = shalt.err (!%p3727_p3)
}
 0x504   : > { %s3731_s10 = scalar_lea.hbm %s4392_s19, 512  ;;  %s3735_s15 = scalar_lea.hbm %s4445_s6, 1024 }
 0x505   : > { %p3732_p4 = scmp.ne.s32.totalorder %s4392_s19, %s3731_s10  ;;  %p3736_p9 = scmp.lt.u32.totalorder %s4392_s19, %s4445_s6 }
 0x506   : > { %p3737_p10 = scmp.lt.u32.totalorder %s3735_s15, %s3731_s10  ;;  %p3739_p12 = scmp.lt.u32.totalorder %s3731_s10, %s4392_s19 }
 0x507   : > { %p3733_p7 = pnand %p3732_p4, %p3858_p5 }
 0x508   : > { %p3738_p11 = por %p3737_p10, %p3736_p9 }
 0x509   : > { %p3734_p8 = pneg %p3733_p7 }
 0x50a   : > { %p3740_p13 = por %p3739_p12, %p3738_p11 }
 0x50c   : > { %p3741_p0 = pnand %p3740_p13, %p3734_p8 }
 0x50e   : > { %3744 = shalt.err (!%p3741_p0)
}
 0x50f   : > { %s3783_s29 = smov 128   ;;  %s3784_s17 = smov 8  }
 0x510   : > { %3609 = dma.vmem_to_hbm [thread:$0]  (%p3858_p5), %s4394_s16, 512, %s4392_s19, %s4398_s25, %s3783_s29, %s3783_s29, %s3784_s17  }
 0x511 PF: > { %p3615_p1 = scmp.ge.s32.totalorder %s3779_s24, 2  ;;  %s2795_s18 = sand.u32 1, %s3767_s21  }
 0x512   : > { %s2796_s20 = scalar_lea.sflag [#allocation3], %s2795_s18 }
 0x513   : > { %p3612_p2 = pnand %p3615_p1, %p3862_p6 }
 0x515   : > { %3762 = dma.done.wait (!%p3612_p2), %s2796_s20, 512  }
 0x516   : > { %3764 = vsyncadd (!%p3612_p2), %s2796_s20, 4294966784  ;;  %p16_p3 = scmp.ge.s32.totalorder %s3845_s27, 4   ;;  %s4450_s21 = smov %s3771_s22 }
 0x517   : > { %s4451_s22 = smov %s3775_s23  ;;  %s4452_s23 = smov %s3856_s30 }
 0x518   : > { %s4453_s24 = smov %s3845_s27  ;;  %18 = sbr.rel (!%p16_p3) target bundleno = 3 (0x3), region = 83 }
 0x51f   :  { %2801 = vsyncpa [#allocation3], 1 }
 0x520   :  { %2803 = vsyncpa [#allocation3 + $0x1], 1 }

</bundles_post_ra>
